<compile_context>
chip_gen: v7x
topology: tpu7x:2x2x1
jax: 0.10.0
libtpu: 0.0.40
codegen_flags: <defaults>
</compile_context>

<pallas_src>
import jax
import jax.numpy as jnp
from jax import lax
from jax.experimental import pallas as pl
from jax.experimental.pallas import tpu as pltpu


def _discriminator_kernel(x_ref, w1_ref, w2_ref, pk_ref, o_ref):
    # x_ref : [TB, D_in] f32 (streamed over batch)
    # w1_ref: [N, D_in]  bf16 (resident, PyTorch [out, in] layout)
    # w2_ref: [N, N]     bf16 (resident)
    # pk_ref: [3N+1, 1]  f32  (resident; b1 | b2 | b3 | w3 packed as a column)
    # o_ref : [1, TB]    f32  (lane-dense output row)
    w1 = w1_ref[...]
    w2 = w2_ref[...]
    pk = pk_ref[...]
    n = w1.shape[0]

    b1 = pk[0:n, :]                        # [N, 1]
    b2 = pk[n:2 * n, :]                    # [N, 1]
    b3 = pk[2 * n:2 * n + 1, :]            # [1, 1]
    w3col = pk[2 * n + 1:3 * n + 1, :]     # [N, 1]

    # In-kernel f32 -> bf16 cast of the streamed block (free VALU filler).
    x_bf = x_ref[...].astype(w1.dtype)     # [TB, D_in]

    # Layer 1: h1^T = relu(W1 @ x^T + b1) -> [N, TB]
    # (contract D_in of both operands; no host-side transpose needed)
    h1 = lax.dot_general(w1, x_bf, (((1,), (1,)), ((), ())),
                         preferred_element_type=jnp.float32) + b1
    h1 = jnp.maximum(h1, 0.0)

    # Layer 2: h2^T = relu(W2 @ h1^T + b2) -> [N, TB]
    h2 = jnp.dot(w2, h1.astype(w2.dtype), preferred_element_type=jnp.float32) + b2
    h2 = jnp.maximum(h2, 0.0)

    # Layer 3 (N -> 1) + Sigmoid, computed on VPU (broadcast mul) + XLU
    # (sublane reduce) instead of the MXU.
    logits = jnp.sum(h2 * w3col, axis=0, keepdims=True) + b3   # [1, TB]
    o_ref[...] = jax.nn.sigmoid(logits).astype(o_ref.dtype)


def discriminator_forward(x, params, *, tile_b=2048, compute_dtype=jnp.bfloat16):
    """x: [B, z_dim + CLASS_NUM] float32.  params: PyTorch-layout weights/biases."""
    w1, b1, w2, b2, w3, b3 = (params["w1"], params["b1"], params["w2"],
                              params["b2"], params["w3"], params["b3"])
    B, d_in = x.shape

    # Batch tile: clamp to [128, 8192], force a multiple of 128, and don't
    # exceed the padded batch.  VMEM at tb=8192 is still tiny (x block ~384 KiB
    # f32 double-buffered, h1/h2 ~1 MiB each), so this fits all generations.
    tb = max(128, min(int(tile_b), 8192))
    tb = 128 * pl.cdiv(tb, 128)
    tb = min(tb, 128 * pl.cdiv(B, 128))
    num_tiles = pl.cdiv(B, tb)
    b_pad = num_tiles * tb

    w1c = w1.astype(compute_dtype)
    w2c = w2.astype(compute_dtype)
    # Pack b1 | b2 | b3 | w3 into one resident f32 column (one DMA descriptor).
    packed = jnp.concatenate(
        [b1.reshape(-1), b2.reshape(-1), b3.reshape(-1), w3.reshape(-1)]
    ).reshape(-1, 1).astype(jnp.float32)                     # [3N+1, 1]

    resident = lambda a: pl.BlockSpec(a.shape, lambda i: (0,) * a.ndim)

    out = pl.pallas_call(
        _discriminator_kernel,
        out_shape=jax.ShapeDtypeStruct((1, b_pad), jnp.float32),
        grid_spec=pltpu.PrefetchScalarGridSpec(
            num_scalar_prefetch=0,
            grid=(num_tiles,),
            in_specs=[
                # x streamed straight from HBM as [tb, d_in] f32 blocks; the
                # last (partial) block's out-of-bounds rows are garbage that
                # only lands in padded output lanes, which get sliced off.
                pl.BlockSpec((tb, d_in), lambda i: (i, 0)),
                resident(w1c), resident(w2c), resident(packed),
            ],
            out_specs=pl.BlockSpec((1, tb), lambda i: (0, i)),
        ),
        compiler_params=pltpu.CompilerParams(
            dimension_semantics=("parallel",),
        ),
    )(x, w1c, w2c, packed)

    return out[0, :B].reshape(B, 1)


def init_params(key, z_dim, class_num, N):
    """PyTorch nn.Linear-style init/layout: W is [out, in], b is [out]."""
    d_in = z_dim + class_num
    ks = jax.random.split(key, 6)

    def uni(k, shape, fan_in):
        bound = 1.0 / jnp.sqrt(float(fan_in))
        return jax.random.uniform(k, shape, jnp.float32, -bound, bound)

    return {
        "w1": uni(ks[0], (N, d_in), d_in), "b1": uni(ks[1], (N,), d_in),
        "w2": uni(ks[2], (N, N), N),       "b2": uni(ks[3], (N,), N),
        "w3": uni(ks[4], (1, N), N),       "b3": uni(ks[5], (1,), N),
    }


def _reference(x, params, compute_dtype=jnp.bfloat16):
    """Plain-JAX reference with matching bf16-input / f32-accumulate matmuls
    for layers 1-2 and an f32 layer-3 (matches the kernel's VPU path)."""
    w1, b1, w2, b2, w3, b3 = (params["w1"], params["b1"], params["w2"],
                              params["b2"], params["w3"], params["b3"])
    xc = x.astype(compute_dtype)
    h1 = jnp.maximum(
        jnp.dot(xc, w1.T.astype(compute_dtype),
                preferred_element_type=jnp.float32) + b1, 0.0)
    h2 = jnp.maximum(
        jnp.dot(h1.astype(compute_dtype), w2.T.astype(compute_dtype),
                preferred_element_type=jnp.float32) + b2, 0.0)
    logits = jnp.dot(h2, w3.T.astype(jnp.float32)) + b3
    return jax.nn.sigmoid(logits)


if __name__ == "__main__":
    CLASS_NUM = 10
    z_dim = 2        # 2-D Gaussian latent (per the script name)
    N = 32           # hidden width

    key = jax.random.PRNGKey(0)
    k_x, k_p, k_x2 = jax.random.split(key, 3)
    params = init_params(k_p, z_dim, CLASS_NUM, N)

    # Small batch (matches original usage) -> single grid step, partial block.
    x_small = jax.random.normal(k_x, (8, z_dim + CLASS_NUM), dtype=jnp.float32)
    out_small = jax.block_until_ready(discriminator_forward(x_small, params))
    assert out_small.shape == (8, 1)
    assert jnp.allclose(out_small, _reference(x_small, params),
                        atol=2e-3, rtol=2e-3), "mismatch vs reference (small batch)"

    # Larger, non-tile-multiple batch -> resident weights, partial last block.
    x_big = jax.random.normal(k_x2, (1000, z_dim + CLASS_NUM), dtype=jnp.float32)
    out_big = jax.block_until_ready(discriminator_forward(x_big, params))
    assert out_big.shape == (1000, 1)
    assert jnp.allclose(out_big, _reference(x_big, params),
                        atol=2e-3, rtol=2e-3), "mismatch vs reference (large batch)"

    print("KERNEL_OK")
</pallas_src>

<mosaic_0001>
module attributes {stable_mosaic.version = 11 : i64} {
  func.func @_discriminator_kernel(%arg0: i32, %arg1: memref<128x12xf32, #tpu.memory_space<vmem>>, %arg2: memref<32x12xbf16, #tpu.memory_space<vmem>>, %arg3: memref<32x32xbf16, #tpu.memory_space<vmem>>, %arg4: memref<97x1xf32, #tpu.memory_space<vmem>>, %arg5: memref<1x128xf32, #tpu.memory_space<vmem>>) attributes {dimension_semantics = [#tpu.dimension_semantics<parallel>], iteration_bounds = array<i64: 1>, scalar_prefetch = 0 : i64, scratch_operands = 0 : i64, tpu.core_type = #tpu.core_type<tc>, window_params = [{transform_indices = @transform_0, window_bounds = array<i64: 128, 12>}, {pipeline_mode = #tpu.pipeline_mode<synchronous>, transform_indices = @transform_1, window_bounds = array<i64: 32, 12>}, {pipeline_mode = #tpu.pipeline_mode<synchronous>, transform_indices = @transform_2, window_bounds = array<i64: 32, 32>}, {pipeline_mode = #tpu.pipeline_mode<synchronous>, transform_indices = @transform_3, window_bounds = array<i64: 97, 1>}, {transform_indices = @transform_4, window_bounds = array<i64: 1, 128>}]} {
    %c0 = arith.constant 0 : index
    %c0_0 = arith.constant 0 : index
    %0 = vector.load %arg2[%c0, %c0_0] : memref<32x12xbf16, #tpu.memory_space<vmem>>, vector<32x12xbf16>
    %c0_1 = arith.constant 0 : index
    %c0_2 = arith.constant 0 : index
    %1 = vector.load %arg3[%c0_1, %c0_2] : memref<32x32xbf16, #tpu.memory_space<vmem>>, vector<32x32xbf16>
    %c0_3 = arith.constant 0 : index
    %c0_4 = arith.constant 0 : index
    %2 = vector.load %arg4[%c0_3, %c0_4] : memref<97x1xf32, #tpu.memory_space<vmem>>, vector<97x1xf32>
    %3 = vector.extract_strided_slice %2 {offsets = [0, 0], sizes = [32, 1], strides = [1, 1]} : vector<97x1xf32> to vector<32x1xf32>
    %4 = vector.extract_strided_slice %2 {offsets = [32, 0], sizes = [32, 1], strides = [1, 1]} : vector<97x1xf32> to vector<32x1xf32>
    %5 = vector.extract_strided_slice %2 {offsets = [64, 0], sizes = [1, 1], strides = [1, 1]} : vector<97x1xf32> to vector<1x1xf32>
    %6 = vector.extract_strided_slice %2 {offsets = [65, 0], sizes = [32, 1], strides = [1, 1]} : vector<97x1xf32> to vector<32x1xf32>
    %c0_5 = arith.constant 0 : index
    %c0_6 = arith.constant 0 : index
    %7 = vector.load %arg1[%c0_5, %c0_6] : memref<128x12xf32, #tpu.memory_space<vmem>>, vector<128x12xf32>
    %8 = arith.truncf %7 : vector<128x12xf32> to vector<128x12xbf16>
    %cst = arith.constant dense<0.000000e+00> : vector<32x128xf32>
    %9 = tpu.matmul %0, %8, %cst {dimension_numbers = #tpu.dot_dimension_numbers<[1], [1], [0], [0], [0, 0, 1, 0], [], []>} : vector<32x12xbf16>, vector<128x12xbf16>, vector<32x128xf32> -> vector<32x128xf32>
    %10 = vector.broadcast %3 : vector<32x1xf32> to vector<32x128xf32>
    %11 = arith.addf %9, %10 : vector<32x128xf32>
    %cst_7 = arith.constant 0.000000e+00 : f32
    %12 = vector.broadcast %cst_7 : f32 to vector<32x128xf32>
    %13 = arith.maximumf %11, %12 : vector<32x128xf32>
    %14 = arith.truncf %13 : vector<32x128xf32> to vector<32x128xbf16>
    %cst_8 = arith.constant dense<0.000000e+00> : vector<32x128xf32>
    %15 = tpu.matmul %1, %14, %cst_8 {dimension_numbers = #tpu.dot_dimension_numbers<[1], [0], [0], [1], [0, 0, 1, 1], [], []>} : vector<32x32xbf16>, vector<32x128xbf16>, vector<32x128xf32> -> vector<32x128xf32>
    %16 = vector.broadcast %4 : vector<32x1xf32> to vector<32x128xf32>
    %17 = arith.addf %15, %16 : vector<32x128xf32>
    %cst_9 = arith.constant 0.000000e+00 : f32
    %18 = vector.broadcast %cst_9 : f32 to vector<32x128xf32>
    %19 = arith.maximumf %17, %18 : vector<32x128xf32>
    %20 = vector.broadcast %6 : vector<32x1xf32> to vector<32x128xf32>
    %21 = arith.mulf %19, %20 : vector<32x128xf32>
    %cst_10 = arith.constant dense<0.000000e+00> : vector<128xf32>
    %22 = vector.multi_reduction <add>, %21, %cst_10 [0] : vector<32x128xf32> to vector<128xf32>
    %23 = vector.shape_cast %22 : vector<128xf32> to vector<1x128xf32>
    %24 = vector.broadcast %5 : vector<1x1xf32> to vector<1x128xf32>
    %25 = arith.addf %23, %24 : vector<1x128xf32>
    %26 = arith.negf %25 : vector<1x128xf32>
    %27 = math.exp %26 : vector<1x128xf32>
    %cst_11 = arith.constant 1.000000e+00 : f32
    %28 = vector.broadcast %cst_11 : f32 to vector<1x128xf32>
    %29 = arith.addf %28, %27 : vector<1x128xf32>
    %30 = arith.divf %28, %29 : vector<1x128xf32>
    %c0_12 = arith.constant 0 : index
    %c0_13 = arith.constant 0 : index
    %31 = vector.load %arg5[%c0_12, %c0_13] : memref<1x128xf32, #tpu.memory_space<vmem>>, vector<1x128xf32>
    tpu.vector_store %arg5[%c0_12, %c0_13], %30 {strides = array<i32>} : memref<1x128xf32, #tpu.memory_space<vmem>>, vector<1x128xf32>,
    return
  }
  func.func @transform_0(%arg0: i32) -> (i32, i32) {
    %c0_i32 = arith.constant 0 : i32
    %c0_i32_0 = arith.constant 0 : i32
    return %arg0, %c0_i32 : i32, i32
  }
  func.func @transform_1(%arg0: i32) -> (i32, i32) {
    %c0_i32 = arith.constant 0 : i32
    %c0_i32_0 = arith.constant 0 : i32
    %c0_i32_1 = arith.constant 0 : i32
    return %c0_i32, %c0_i32_0 : i32, i32
  }
  func.func @transform_2(%arg0: i32) -> (i32, i32) {
    %c0_i32 = arith.constant 0 : i32
    %c0_i32_0 = arith.constant 0 : i32
    %c0_i32_1 = arith.constant 0 : i32
    return %c0_i32, %c0_i32_0 : i32, i32
  }
  func.func @transform_3(%arg0: i32) -> (i32, i32) {
    %c0_i32 = arith.constant 0 : i32
    %c0_i32_0 = arith.constant 0 : i32
    %c0_i32_1 = arith.constant 0 : i32
    return %c0_i32, %c0_i32_0 : i32, i32
  }
  func.func @transform_4(%arg0: i32) -> (i32, i32) {
    %c0_i32 = arith.constant 0 : i32
    %c0_i32_0 = arith.constant 0 : i32
    return %c0_i32, %arg0 : i32, i32
  }
}

</mosaic_0001>

<bundles_post_ra>
// kernel: tpu_custom_call.1
= control target key start
LH: loop header
LB: loop body
LE: loop exit
PB: predicated region body
PF: predicated region fallthrough
CT: control target
= control target key end

     0   :  { %vm94_vm0 = vcmask 97280   ;;  %v435_v5 = vmov 0   ;;  %s597_s0 = inlined_call_operand.vmem [shape: f32[8,12], index: 0, kind: input, shape index: {}]   ;;  %s598_s1 = inlined_call_operand.vmem [shape: bf16[32,12], index: 1, kind: input, shape index: {}]   ;;  %s599_s2 = inlined_call_operand.vmem [shape: bf16[32,32], index: 2, kind: input, shape index: {}]   ;;  %s600_s3 = inlined_call_operand.vmem [shape: f32[97,1], index: 3, kind: input, shape index: {}]   ;;  %s601_s4 = inlined_call_operand.hbm [shape: f32[1,128], index: 4, kind: output, shape index: {}]  }
   0x1   :  { %v40_v0 = vld [vmem:[%s597_s0] sm:$0xff]  ;;  %v41_v1 = vld [vmem:[%s597_s0 + $0x8] sm:$0xff]  ;;  %v42_v2 = vld [vmem:[%s597_s0 + $0x10] sm:$0xff]  ;;  %401 = vset.pattern.permute.xlu0 %v435_v5  ;;  %402 = vset.pattern.permute.xlu1 %v435_v5 }
   0x2   :  { %v56_v3 = vpack.c.bf16 %v41_v1, %v40_v0  ;;  %v43_v4 = vld [vmem:[%s597_s0 + $0x18] sm:$0xff]  ;;  %v44_v8 = vld [vmem:[%s597_s0 + $0x20] sm:$0xff]  ;;  %v45_v9 = vld [vmem:[%s597_s0 + $0x28] sm:$0xff] }
   0x3   :  { %v57_v6 = vpack.c.bf16 %v43_v4, %v42_v2  ;;  %v403_v10 = vld [vmem:[%s598_s1] sm:$0xff]   ;;  %v29_v12 = vld [vmem:[%s600_s3 + $0x10] sm:$0xff]  ;;  %v58_v14 = vpack.c.bf16 %v45_v9, %v44_v8  ;;  %v28_v15 = vld [vmem:[%s600_s3 + $0x8] sm:$0xff] }
   0x4   :  { %391 = vmatprep.subr.msk.bf16.mxu0 %vm94_vm0, %v56_v3  ;;  %v102_v7 = vsel %vm94_vm0, %v56_v3, 0  ;;  %v27_v11 = vld [vmem:[%s600_s3] sm:$0xff]  ;;  %379 = vmatprep.mubr.msk.bf16.mxu0 %vm94_vm0, %v403_v10  ;;  %v30_v16 = vld [vmem:[%s600_s3 + $0x18] sm:$0xff] }
   0x5   :  { %364 = vmatpush3.bf16.xpose.msra.mxu0 %v102_v7  ;;  %66 = vperm.xlu0 %401, %v27_v11   ;;  %v105_v13 = vsel %vm94_vm0, %v57_v6, 0  ;;  %v31_v17 = vld [vmem:[%s600_s3 + $0x20] sm:$0xff] }
   0x6   :  { %392 = vmatprep.subr.msk.bf16.mxu0 %vm94_vm0, %v57_v6  ;;  %76 = vperm.xlu1 %402, %v29_v12  }
   0x9   :  { %71 = vperm.xlu0 %401, %v28_v15  }
   0xa   :  { %81 = vperm.xlu1 %402, %v30_v16  }
   0xd   :  { %366 = vmatpush3.bf16.xpose.msra.mxu0 %v105_v13 }
   0xe   :  { %393 = vmatprep.subr.msk.bf16.mxu0 %vm94_vm0, %v58_v14 }
   0xf   :  { %9 = vsyncpa [#allocation3], 0  ;;  %v46_v18 = vld [vmem:[%s597_s0 + $0x30] sm:$0xff]  ;;  %v47_v19 = vld [vmem:[%s597_s0 + $0x38] sm:$0xff]  ;;  %182 = vperm.xlu0 %401, %v31_v17   ;;  %v108_v21 = vsel %vm94_vm0, %v58_v14, 0  ;;  %vm210_vm1 = vcmask 261120  }
  0x10   :  { %v32_v20 = vld [vmem:[%s600_s3 + $0x28] sm:$0xff]  ;;  %v59_v22 = vpack.c.bf16 %v47_v19, %v46_v18  ;;  %v35_v23 = vld [vmem:[%s600_s3 + $0x40] sm:$0xff]  ;;  %v37_v25 = vld [vmem:[%s600_s3 + $0x50] sm:$0xff]  ;;  %vm290_vm2 = vcmask 1046528  }
  0x11   :  { %187 = vperm.xlu1 %402, %v32_v20   ;;  %v36_v24 = vld [vmem:[%s600_s3 + $0x48] sm:$0xff]  ;;  %v48_v26 = vld [vmem:[%s597_s0 + $0x40] sm:$0xff]  ;;  %v33_v28 = vld [vmem:[%s600_s3 + $0x30] sm:$0xff] }
  0x12   :  { %v49_v27 = vld [vmem:[%s597_s0 + $0x48] sm:$0xff]  ;;  %v111_v29 = vsel %vm94_vm0, %v59_v22, 0  ;;  %v38_v31 = vld [vmem:[%s600_s3 + $0x58] sm:$0xff]  ;;  %v39_v33 = vld [vmem:[%s600_s3 + $0x60] sm:$0x1] }
  0x13   :  { %272 = vperm.xlu0 %401, %v35_v23   ;;  %v60_v30 = vpack.c.bf16 %v49_v27, %v48_v26  ;;  %v34_v32 = vld [vmem:[%s600_s3 + $0x38] sm:$0xff]  ;;  %v50_v34 = vld [vmem:[%s597_s0 + $0x50] sm:$0xff]  ;;  %v52_v38 = vld [vmem:[%s597_s0 + $0x60] sm:$0xff] }
  0x14   :  { %v51_v35 = vld [vmem:[%s597_s0 + $0x58] sm:$0xff]  ;;  %v53_v39 = vld [vmem:[%s597_s0 + $0x68] sm:$0xff]  ;;  %v54_v42 = vld [vmem:[%s597_s0 + $0x70] sm:$0xff] }
  0x15   :  { %368 = vmatpush3.bf16.xpose.msra.mxu0 %v108_v21  ;;  %276 = vperm.xlu1 %402, %v36_v24   ;;  %v114_v36 = vsel %vm94_vm0, %v60_v30, 0  ;;  %v61_v37 = vpack.c.bf16 %v51_v35, %v50_v34  ;;  %v62_v41 = vpack.c.bf16 %v53_v39, %v52_v38  ;;  %v55_v43 = vld [vmem:[%s597_s0 + $0x78] sm:$0xff]  ;;  %v404_v47 = vld [vmem:[%s598_s1 + $0x8] sm:$0xff]   ;;  %v405_v48 = vld [vmem:[%s599_s2] sm:$0xff]  }
  0x16   :  { %394 = vmatprep.subr.msk.bf16.mxu0 %vm94_vm0, %v59_v22  ;;  %v63_v45 = vpack.c.bf16 %v55_v43, %v54_v42  ;;  %387 = vmatprep.mubr.msk.bf16.mxu1 %vm210_vm1, %v405_v48  ;;  %v406_v3 = vld [vmem:[%s599_s2 + $0x8] sm:$0xff]   ;;  %s436_s2 = smov [#allocation2]  }
  0x17   :  { %280 = vperm.xlu0 %401, %v37_v25   ;;  %v117_v40 = vsel %vm94_vm0, %v61_v37, 0  ;;  %v120_v44 = vsel %vm94_vm0, %v62_v41, 0  ;;  %s332_s26 = sshll.u32 %s436_s2, 4  ;;  %s333_s26 = int_to_ptr.vmem [resolvable:$true] %s332_s26 }
  0x18   :  { %v123_v46 = vsel %vm94_vm0, %v63_v45, 0  ;;  %s411_s27 = scalar_lea.vmem %s333_s26, 16  ;;  %s415_s28 = scalar_lea.vmem %s333_s26, 32 }
  0x19   :  { %192 = vperm.xlu1 %402, %v33_v28   ;;  %p412_p0 = scmp.ne.s32.totalorder %s333_s26, %s411_s27  ;;  %p416_p1 = scmp.lt.s32.totalorder %s333_s26, %s333_s26 }
  0x1a   :  { %p417_p2 = scmp.lt.s32.totalorder %s415_s28, %s411_s27 }
  0x1b   :  { %284 = vperm.xlu0 %401, %v38_v31  }
  0x1c   :  { %p418_p3 = por %p417_p2, %p416_p1 }
  0x1d   :  { %370 = vmatpush3.bf16.xpose.msra.mxu0 %v111_v29  ;;  %197 = vperm.xlu1 %402, %v34_v32  }
  0x1e   :  { %395 = vmatprep.subr.msk.bf16.mxu0 %vm94_vm0, %v60_v30  ;;  %p419_p4 = pnand %p418_p3, %p412_p0 }
  0x1f   :  { %288 = vperm.xlu0 %401, %v39_v33  }
  0x25   :  { %372 = vmatpush3.bf16.xpose.msra.mxu0 %v114_v36 }
  0x26   :  { %396 = vmatprep.subr.msk.bf16.mxu0 %vm94_vm0, %v61_v37 }
  0x2d   :  { %374 = vmatpush3.bf16.xpose.msra.mxu0 %v117_v40 }
  0x2e   :  { %397 = vmatprep.subr.msk.bf16.mxu0 %vm94_vm0, %v62_v41 }
  0x35   :  { %376 = vmatpush3.bf16.xpose.msra.mxu0 %v120_v44 }
  0x36   :  { %398 = vmatprep.subr.msk.bf16.mxu0 %vm94_vm0, %v63_v45 }
  0x3d   :  { %378 = vmatpush3.bf16.xpose.msra.mxu0 %v123_v46 }
  0x44   :  { %380 = vmatmul.mubr.msk.bf16.vlgmr.msra.gmra.mrb[0].mxu0 %vm94_vm0, %v404_v47 }
  0x84   :  { %v67_v50 = vpop.permute.xlu0 %66 }
  0x85   :  { %v77_v49 = vpop.permute.xlu1 %76 }
  0x88   :  { %v72_v57 = vpop.permute.xlu0 %71 }
  0x89   :  { %v82_v54 = vpop.permute.xlu1 %81 }
  0x8e   :  { %v183_v4 = vpop.permute.xlu0 %182 }
  0x90   :  { %v188_v5 = vpop.permute.xlu1 %187 }
  0x92   :  { %v273_v6 = vpop.permute.xlu0 %272 }
  0x93   :  { %v291_v16 = vrot.slane %v273_v6, 1 }
  0x94   :  { %v277_v7 = vpop.permute.xlu1 %276 }
  0x95   :  { %v292_v18 = vrot.slane %v277_v7, 1 }
  0x96   :  { %v281_v8 = vpop.permute.xlu0 %280 }
  0x97   :  { %v294_v17 = vrot.slane %v281_v8, 1  ;;  %v293_v29 = vsel %vm290_vm2, %v291_v16, %v292_v18 }
  0x98   :  { %v193_v9 = vpop.permute.xlu1 %192 }
  0x99   :  { %v295_v30 = vsel %vm290_vm2, %v292_v18, %v294_v17 }
  0x9a   :  { %v285_v10 = vpop.permute.xlu0 %284 }
  0x9b   :  { %v296_v25 = vrot.slane %v285_v10, 1 }
  0x9c   :  { %v198_v19 = vpop.permute.xlu1 %197 }
  0x9d   :  { %v297_v34 = vsel %vm290_vm2, %v294_v17, %v296_v25 }
  0x9e   :  { %v289_v21 = vpop.permute.xlu0 %288 }
  0x9f   :  { %v298_v28 = vrot.slane %v289_v21, 1 }
  0xa1   :  { %v299_v37 = vsel %vm290_vm2, %v296_v25, %v298_v28 }
 0x117   :  { %v381_v51 = vpop.f32.mrb[0].mxu0 }
 0x118   :  { %v168_v52 = vadd.f32 %v381_v51, %v77_v49  ;;  %v159_v53 = vpop.f32.mrb[1].mxu0 }
 0x119   :  { %v160_v55 = vadd.f32 %v159_v53, %v67_v50  ;;  %v382_v56 = vpop.f32.mrb[2].mxu0 }
 0x11a   :  { %v171_v58 = vadd.f32 %v382_v56, %v82_v54  ;;  %v162_v59 = vpop.f32.mrb[3].mxu0  ;;  %v176_v61 = vmax.f32 %v168_v52, 0.0 }
 0x11b   :  { %v163_v60 = vadd.f32 %v162_v59, %v72_v57  ;;  %v174_v63 = vmax.f32 %v160_v55, 0.0 }
 0x11c   :  { %v177_v62 = vmax.f32 %v171_v58, 0.0 }
 0x11d   :  { %v175_v0 = vmax.f32 %v163_v60, 0.0 }
 0x11e   :  { %v179_v1 = vpack.c.bf16 %v177_v62, %v176_v61 }
 0x11f   :  { %v178_v2 = vpack.c.bf16 %v175_v0, %v174_v63 }
 0x121   :  { %383 = vmatprep.subr.bf16.mxu1 %v178_v2 }
 0x122   :  { %384 = vmatpush3.bf16.msra.mxu1 %v178_v2 }
 0x123   :  { %385 = vmatprep.subr.bf16.mxu1 %v179_v1 }
 0x126   :  { %386 = vmatpush3.bf16.msra.mxu1 %v179_v1 }
 0x129   :  { %388 = vmatmul.mubr.msk.bf16.vlgmr.msra.gmra.mrb[0].mxu1 %vm210_vm1, %v406_v3 }
 0x1fc   :  { %v389_v11 = vpop.f32.mrb[0].mxu1 }
 0x1fd   :  { %v251_v12 = vpop.f32.mrb[1].mxu1  ;;  %v260_v13 = vadd.f32 %v389_v11, %v193_v9 }
 0x1fe   :  { %v252_v14 = vadd.f32 %v251_v12, %v183_v4  ;;  %v390_v15 = vpop.f32.mrb[2].mxu1 }
 0x1ff   :  { %v254_v20 = vpop.f32.mrb[3].mxu1  ;;  %v263_v23 = vadd.f32 %v390_v15, %v198_v19  ;;  %v268_v26 = vmax.f32 %v260_v13, 0.0 }
 0x200   :  { %v266_v22 = vmax.f32 %v252_v14, 0.0  ;;  %v255_v24 = vadd.f32 %v254_v20, %v188_v5 }
 0x201   :  { %v269_v32 = vmax.f32 %v263_v23, 0.0  ;;  %v306_v35 = vmul.f32 %v297_v34, %v268_v26 }
 0x202   :  { %v267_v27 = vmax.f32 %v255_v24, 0.0  ;;  %v304_v31 = vmul.f32 %v293_v29, %v266_v22 }
 0x203   :  { %v307_v38 = vmul.f32 %v299_v37, %v269_v32 }
 0x204   :  { %v305_v33 = vmul.f32 %v295_v30, %v267_v27 }
 0x206   :  { %v308_v36 = vadd.f32 %v305_v33, %v304_v31 }
 0x208   :  { %v309_v39 = vadd.f32 %v308_v36, %v306_v35 }
 0x20a   :  { %v310_v40 = vadd.f32 %v309_v39, %v307_v38 }
 0x20c   :  { %v311_v41 = vrot.slane %v310_v40, 4 }
 0x20e   :  { %v312_v42 = vadd.f32 %v311_v41, %v310_v40 }
 0x210   :  { %v313_v43 = vrot.slane %v312_v42, 2 }
 0x212   :  { %v314_v44 = vadd.f32 %v313_v43, %v312_v42 }
 0x214   :  { %v315_v45 = vrot.slane %v314_v44, 1 }
 0x216   :  { %v316_v46 = vadd.f32 %v315_v45, %v314_v44 }
 0x218   :  { %v318_v47 = vadd.f32 %v316_v46, %v273_v6 }
 0x21a   :  { %v348_v48 = vmul.f32 -1.442695, %v318_v47 }
 0x21c   :  { %407 = vpow2.f32 %v348_v48 }
 0x226   :  { %v408_v49 = vpop.eup %407 }
 0x227   :  { %v322_v50 = vadd.f32 1.0, %v408_v49 }
 0x229   :  { %409 = vrcp.f32 %v322_v50 }
 0x233   :  { %v410_v51 = vpop.eup %409 }
 0x234   :  { %325 = vst [vmem:[#allocation2] sm:$0x1] %v410_v51 }
 0x235   :  { %422 = shalt.err (!%p419_p4)
}
 0x236   :  { %s423_s5 = scalar_lea.hbm %s601_s4, 16 }
 0x237   :  { %p424_p5 = scmp.ne.s32.totalorder %s601_s4, %s423_s5  ;;  %p427_p6 = scmp.lt.u32.totalorder %s423_s5, %s601_s4 }
 0x239   :  { %p429_p7 = pnand %p427_p6, %p424_p5 }
 0x23b   :  { %432 = shalt.err (!%p429_p7)
}
 0x23c   :  { %335 = dma.vmem_to_hbm [thread:$0]  %s333_s26, 16, %s601_s4, [#allocation3]  }
 0x23d   :  { %433 = dma.done.wait [#allocation3], 16  }
 0x23e   :  { %434 = vsyncadd [#allocation3], 4294967280 }
 0x23f   :  { %339 = vsyncpa [#allocation3], 1 }

</bundles_post_ra>
